<compile_context>
chip_gen: v7x
topology: tpu7x:2x2x1
jax: 0.10.0
libtpu: 0.0.40
codegen_flags: <defaults>
</compile_context>

<pallas_src>
import functools

import jax
import jax.numpy as jnp
from jax.experimental import pallas as pl
from jax.experimental.pallas import tpu as pltpu

HIDDEN = 100
HIDDEN_PAD = 128   # lane-aligned hidden dim
LANE = 128         # lane-aligned output dim


def mlp_kernel(x_ref, w1_ref, b1_ref, w2_ref, b2_ref, o_ref, *, out_size):
    # fc1: (TM, in) @ (in, HIDDEN_PAD) + b1
    x = x_ref[...]
    h = jnp.dot(x, w1_ref[...], preferred_element_type=jnp.float32) + b1_ref[...]
    # sigmoid on the EUP path (padded hidden units -> 0.5, killed by zero w2 rows)
    h = jax.nn.sigmoid(h)
    # fc2: (TM, HIDDEN_PAD) @ (HIDDEN_PAD, LANE) + b2
    z = jnp.dot(h, w2_ref[...], preferred_element_type=jnp.float32) + b2_ref[...]
    # mask padded output lanes before log_softmax over dim=1
    lane = jax.lax.broadcasted_iota(jnp.int32, z.shape, dimension=1)
    z = jnp.where(lane < out_size, z, jnp.float32(-1e30))
    m = jnp.max(z, axis=-1, keepdims=True)
    s = z - m
    lse = jnp.log(jnp.sum(jnp.exp(s), axis=-1, keepdims=True))
    o_ref[...] = (s - lse).astype(o_ref.dtype)


def prepare_params(w1, b1, w2, b2):
    """One-time weight prep: transpose + zero-pad to lane-aligned shapes.

    w1: (100, in), b1: (100,), w2: (out, 100), b2: (out,)
    Returns (w1_t, b1_p, w2_t, b2_p, out_size) with:
      w1_t: (in, 128), b1_p: (1, 128), w2_t: (128, 128), b2_p: (1, 128)
    Padding is inert: padded hidden units have zero rows in w2_t, padded output
    lanes are masked inside the kernel.
    """
    in_size = w1.shape[1]
    out_size = w2.shape[0]
    w1_t = jnp.zeros((in_size, HIDDEN_PAD), jnp.float32).at[:, :HIDDEN].set(w1.T)
    b1_p = jnp.zeros((1, HIDDEN_PAD), jnp.float32).at[:, :HIDDEN].set(b1)
    w2_t = jnp.zeros((HIDDEN_PAD, LANE), jnp.float32).at[:HIDDEN, :out_size].set(w2.T)
    b2_p = jnp.zeros((1, LANE), jnp.float32).at[:, :out_size].set(b2)
    return w1_t, b1_p, w2_t, b2_p, out_size


def net_forward(x, prepared):
    """x: (B, input_size) float32. prepared: output of prepare_params()."""
    w1_t, b1_p, w2_t, b2_p, out_size = prepared
    B, in_size = x.shape

    # batch tiling: sublane-aligned tile, big enough to feed the MXU when B is large
    tm = 256 if B > 256 else max(8, -(-B // 8) * 8)
    b_pad = -(-B // tm) * tm
    if b_pad != B:
        x = jnp.pad(x, ((0, b_pad - B), (0, 0)))
    grid = (b_pad // tm,)

    kernel = functools.partial(mlp_kernel, out_size=out_size)
    out = pl.pallas_call(
        kernel,
        out_shape=jax.ShapeDtypeStruct((b_pad, LANE), jnp.float32),
        grid=grid,
        in_specs=[
            pl.BlockSpec((tm, in_size), lambda i: (i, 0)),          # x: tiled over batch
            pl.BlockSpec((in_size, HIDDEN_PAD), lambda i: (0, 0)),  # w1_t: resident
            pl.BlockSpec((1, HIDDEN_PAD), lambda i: (0, 0)),        # b1
            pl.BlockSpec((HIDDEN_PAD, LANE), lambda i: (0, 0)),     # w2_t: resident
            pl.BlockSpec((1, LANE), lambda i: (0, 0)),              # b2
        ],
        out_specs=pl.BlockSpec((tm, LANE), lambda i: (i, 0)),
        compiler_params=pltpu.CompilerParams(
            dimension_semantics=("parallel",),
        ),
    )(x, w1_t, b1_p, w2_t, b2_p)
    return out[:B, :out_size]


def init_params(key, input_size, output_size, hidden=HIDDEN):
    """Deterministic init mimicking nn.Linear's U(-1/sqrt(fan_in), 1/sqrt(fan_in))."""
    k1, k2, k3, k4 = jax.random.split(key, 4)
    bound1 = 1.0 / jnp.sqrt(input_size)
    bound2 = 1.0 / jnp.sqrt(hidden)
    w1 = jax.random.uniform(k1, (hidden, input_size), jnp.float32, -bound1, bound1)
    b1 = jax.random.uniform(k2, (hidden,), jnp.float32, -bound1, bound1)
    w2 = jax.random.uniform(k3, (output_size, hidden), jnp.float32, -bound2, bound2)
    b2 = jax.random.uniform(k4, (output_size,), jnp.float32, -bound2, bound2)
    return w1, b1, w2, b2


if __name__ == "__main__":
    key = jax.random.PRNGKey(0)
    k_x, k_p = jax.random.split(key)

    batch, input_size, output_size = 8, 64, 10
    x = jax.random.normal(k_x, (batch, input_size), jnp.float32)
    w1, b1, w2, b2 = init_params(k_p, input_size, output_size)

    prepared = prepare_params(w1, b1, w2, b2)   # hoisted, one-time weight prep
    out = net_forward(x, prepared)
    jax.block_until_ready(out)

    # reference check in plain JAX (original, unpadded params)
    h_ref = jax.nn.sigmoid(x @ w1.T + b1)
    z_ref = h_ref @ w2.T + b2
    ref = jax.nn.log_softmax(z_ref, axis=1)
    assert out.shape == (batch, output_size)
    assert jnp.allclose(out, ref, atol=1e-5), "mismatch vs reference"

    print("KERNEL_OK")
</pallas_src>

<mosaic_0001>
module attributes {stable_mosaic.version = 11 : i64} {
  func.func @mlp_kernel(%arg0: i32, %arg1: memref<8x64xf32, #tpu.memory_space<vmem>>, %arg2: memref<64x128xf32, #tpu.memory_space<vmem>>, %arg3: memref<1x128xf32, #tpu.memory_space<vmem>>, %arg4: memref<128x128xf32, #tpu.memory_space<vmem>>, %arg5: memref<1x128xf32, #tpu.memory_space<vmem>>, %arg6: memref<8x128xf32, #tpu.memory_space<vmem>>) attributes {dimension_semantics = [#tpu.dimension_semantics<parallel>], iteration_bounds = array<i64: 1>, scalar_prefetch = 0 : i64, scratch_operands = 0 : i64, tpu.core_type = #tpu.core_type<tc>, window_params = [{transform_indices = @transform_0, window_bounds = array<i64: 8, 64>}, {pipeline_mode = #tpu.pipeline_mode<synchronous>, transform_indices = @transform_1, window_bounds = array<i64: 64, 128>}, {pipeline_mode = #tpu.pipeline_mode<synchronous>, transform_indices = @transform_2, window_bounds = array<i64: 1, 128>}, {pipeline_mode = #tpu.pipeline_mode<synchronous>, transform_indices = @transform_3, window_bounds = array<i64: 128, 128>}, {pipeline_mode = #tpu.pipeline_mode<synchronous>, transform_indices = @transform_4, window_bounds = array<i64: 1, 128>}, {transform_indices = @transform_5, window_bounds = array<i64: 8, 128>}]} {
    %c0 = arith.constant 0 : index
    %c0_0 = arith.constant 0 : index
    %0 = vector.load %arg1[%c0, %c0_0] : memref<8x64xf32, #tpu.memory_space<vmem>>, vector<8x64xf32>
    %c0_1 = arith.constant 0 : index
    %c0_2 = arith.constant 0 : index
    %1 = vector.load %arg2[%c0_1, %c0_2] : memref<64x128xf32, #tpu.memory_space<vmem>>, vector<64x128xf32>
    %cst = arith.constant dense<0.000000e+00> : vector<8x128xf32>
    %2 = tpu.matmul %0, %1, %cst {dimension_numbers = #tpu.dot_dimension_numbers<[1], [0], [0], [1], [0, 0, 1, 1], [], []>} : vector<8x64xf32>, vector<64x128xf32>, vector<8x128xf32> -> vector<8x128xf32>
    %c0_3 = arith.constant 0 : index
    %c0_4 = arith.constant 0 : index
    %3 = vector.load %arg3[%c0_3, %c0_4] : memref<1x128xf32, #tpu.memory_space<vmem>>, vector<1x128xf32>
    %4 = vector.broadcast %3 : vector<1x128xf32> to vector<8x128xf32>
    %5 = arith.addf %2, %4 : vector<8x128xf32>
    %6 = arith.negf %5 : vector<8x128xf32>
    %7 = math.exp %6 : vector<8x128xf32>
    %cst_5 = arith.constant 1.000000e+00 : f32
    %8 = vector.broadcast %cst_5 : f32 to vector<8x128xf32>
    %9 = arith.addf %8, %7 : vector<8x128xf32>
    %10 = arith.divf %8, %9 : vector<8x128xf32>
    %c0_6 = arith.constant 0 : index
    %c0_7 = arith.constant 0 : index
    %11 = vector.load %arg4[%c0_6, %c0_7] : memref<128x128xf32, #tpu.memory_space<vmem>>, vector<128x128xf32>
    %cst_8 = arith.constant dense<0.000000e+00> : vector<8x128xf32>
    %12 = tpu.matmul %10, %11, %cst_8 {dimension_numbers = #tpu.dot_dimension_numbers<[1], [0], [0], [1], [0, 0, 1, 1], [], []>} : vector<8x128xf32>, vector<128x128xf32>, vector<8x128xf32> -> vector<8x128xf32>
    %c0_9 = arith.constant 0 : index
    %c0_10 = arith.constant 0 : index
    %13 = vector.load %arg5[%c0_9, %c0_10] : memref<1x128xf32, #tpu.memory_space<vmem>>, vector<1x128xf32>
    %14 = vector.broadcast %13 : vector<1x128xf32> to vector<8x128xf32>
    %15 = arith.addf %12, %14 : vector<8x128xf32>
    %16 = tpu.iota {dimensions = array<i32: 1>} : vector<8x128xi32>
    %c10_i32 = arith.constant 10 : i32
    %17 = vector.broadcast %c10_i32 : i32 to vector<8x128xi32>
    %18 = arith.cmpi slt, %16, %17 : vector<8x128xi32>
    %cst_11 = arith.constant -1.000000e+30 : f32
    %19 = vector.broadcast %cst_11 : f32 to vector<8x128xf32>
    %20 = arith.select %18, %15, %19 : vector<8x128xi1>, vector<8x128xf32>
    %cst_12 = arith.constant dense<0xFF800000> : vector<8xf32>
    %21 = vector.multi_reduction <maximumf>, %20, %cst_12 [1] : vector<8x128xf32> to vector<8xf32>
    %22 = vector.shape_cast %21 : vector<8xf32> to vector<8x1xf32>
    %23 = vector.broadcast %22 : vector<8x1xf32> to vector<8x128xf32>
    %24 = arith.subf %20, %23 : vector<8x128xf32>
    %25 = math.exp %24 : vector<8x128xf32>
    %cst_13 = arith.constant dense<0.000000e+00> : vector<8xf32>
    %26 = vector.multi_reduction <add>, %25, %cst_13 [1] : vector<8x128xf32> to vector<8xf32>
    %27 = vector.shape_cast %26 : vector<8xf32> to vector<8x1xf32>
    %28 = math.log %27 : vector<8x1xf32>
    %29 = vector.broadcast %28 : vector<8x1xf32> to vector<8x128xf32>
    %30 = arith.subf %24, %29 : vector<8x128xf32>
    %c0_14 = arith.constant 0 : index
    %c0_15 = arith.constant 0 : index
    %31 = vector.load %arg6[%c0_14, %c0_15] : memref<8x128xf32, #tpu.memory_space<vmem>>, vector<8x128xf32>
    tpu.vector_store %arg6[%c0_14, %c0_15], %30 {strides = array<i32>} : memref<8x128xf32, #tpu.memory_space<vmem>>, vector<8x128xf32>,
    return
  }
  func.func @transform_0(%arg0: i32) -> (i32, i32) {
    %c0_i32 = arith.constant 0 : i32
    %c0_i32_0 = arith.constant 0 : i32
    return %arg0, %c0_i32 : i32, i32
  }
  func.func @transform_1(%arg0: i32) -> (i32, i32) {
    %c0_i32 = arith.constant 0 : i32
    %c0_i32_0 = arith.constant 0 : i32
    %c0_i32_1 = arith.constant 0 : i32
    return %c0_i32, %c0_i32_0 : i32, i32
  }
  func.func @transform_2(%arg0: i32) -> (i32, i32) {
    %c0_i32 = arith.constant 0 : i32
    %c0_i32_0 = arith.constant 0 : i32
    %c0_i32_1 = arith.constant 0 : i32
    return %c0_i32, %c0_i32_0 : i32, i32
  }
  func.func @transform_3(%arg0: i32) -> (i32, i32) {
    %c0_i32 = arith.constant 0 : i32
    %c0_i32_0 = arith.constant 0 : i32
    %c0_i32_1 = arith.constant 0 : i32
    return %c0_i32, %c0_i32_0 : i32, i32
  }
  func.func @transform_4(%arg0: i32) -> (i32, i32) {
    %c0_i32 = arith.constant 0 : i32
    %c0_i32_0 = arith.constant 0 : i32
    %c0_i32_1 = arith.constant 0 : i32
    return %c0_i32, %c0_i32_0 : i32, i32
  }
  func.func @transform_5(%arg0: i32) -> (i32, i32) {
    %c0_i32 = arith.constant 0 : i32
    %c0_i32_0 = arith.constant 0 : i32
    return %arg0, %c0_i32 : i32, i32
  }
}

</mosaic_0001>

<bundles_post_ra>
// kernel: tpu_custom_call.1
= control target key start
LH: loop header
LB: loop body
LE: loop exit
PB: predicated region body
PF: predicated region fallthrough
CT: control target
= control target key end

     0   :  { %10 = vsyncpa [#allocation3], 0  ;;  %s622_s0 = inlined_call_operand.hbm [shape: f32[8,64], index: 0, kind: input, shape index: {}]   ;;  %s623_s1 = inlined_call_operand.hbm [shape: f32[64,128], index: 1, kind: input, shape index: {}]   ;;  %s624_s2 = inlined_call_operand.vmem [shape: f32[1,128], index: 2, kind: input, shape index: {}]   ;;  %s625_s3 = inlined_call_operand.hbm [shape: f32[128,128], index: 3, kind: input, shape index: {}]   ;;  %s626_s4 = inlined_call_operand.vmem [shape: f32[1,128], index: 4, kind: input, shape index: {}]   ;;  %s627_s5 = inlined_call_operand.hbm [shape: f32[8,128], index: 5, kind: output, shape index: {}]  }
   0x1   :  { %11 = vsyncpa [#allocation6], 0 }
   0x2   :  { %12 = vsyncpa [#allocation4], 0  ;;  %s511_s18 = smov [#allocation5]   ;;  %s417_s22 = scalar_lea.hbm %s623_s1, 1024 }
   0x3   :  { %s28_s19 = sshll.u32 %s511_s18, 4  ;;  %p418_p0 = scmp.ne.s32.totalorder %s623_s1, %s417_s22  ;;  %s29_s19 = int_to_ptr.vmem [resolvable:$true] %s28_s19 }
   0x4   :  { %p421_p1 = scmp.lt.u32.totalorder %s417_s22, %s623_s1 }
   0x6   :  { %p423_p2 = pnand %p421_p1, %p418_p0 }
   0x8   :  { %426 = shalt.err (!%p423_p2)
}
   0x9   :  { %s427_s27 = scalar_lea.vmem %s29_s19, 1024  ;;  %p432_p4 = scmp.lt.s32.totalorder %s29_s19, %s29_s19 }
   0xa   :  { %p428_p3 = scmp.ne.s32.totalorder %s29_s19, %s427_s27  ;;  %p433_p5 = scmp.lt.s32.totalorder %s427_s27, %s427_s27 }
   0xc   :  { %p434_p6 = por %p433_p5, %p432_p4 }
   0xe   :  { %p435_p7 = pnand %p434_p6, %p428_p3 }
  0x10   :  { %438 = shalt.err (!%p435_p7)
}
  0x11   :  { %s512_s28 = smov 128   ;;  %s513_s29 = smov 8  }
  0x12   :  { %34 = dma.hbm_to_vmem [thread:$0]  %s623_s1, 1024, %s29_s19, [#allocation6], %s512_s28, %s512_s28, %s513_s29  }
  0x13   :  { %s514_s7 = smov [#allocation2]   ;;  %s515_s9 = smov [#allocation7]  }
  0x14   :  { %s19_s8 = sshll.u32 %s514_s7, 4  ;;  %s42_s10 = sshll.u32 %s515_s9, 4  ;;  %s20_s8 = int_to_ptr.vmem [resolvable:$true] %s19_s8  ;;  %s43_s10 = int_to_ptr.vmem [resolvable:$true] %s42_s10 }
  0x15   :  { %s439_s13 = scalar_lea.hbm %s622_s0, 128 }
  0x16   :  { %p440_p8 = scmp.ne.s32.totalorder %s622_s0, %s439_s13  ;;  %p443_p9 = scmp.lt.u32.totalorder %s439_s13, %s622_s0 }
  0x18   :  { %p445_p10 = pnand %p443_p9, %p440_p8 }
  0x1a   :  { %448 = shalt.err (!%p445_p10)
}
  0x1b   :  { %s449_s1 = scalar_lea.vmem %s20_s8, 128  ;;  %p454_p12 = scmp.lt.s32.totalorder %s20_s8, %s20_s8 }
  0x1c   :  { %p450_p11 = scmp.ne.s32.totalorder %s20_s8, %s449_s1  ;;  %p455_p13 = scmp.lt.s32.totalorder %s449_s1, %s449_s1 }
  0x1e   :  { %p456_p0 = por %p455_p13, %p454_p12 }
  0x20   :  { %p457_p1 = pnand %p456_p0, %p450_p11 }
  0x22   :  { %460 = shalt.err (!%p457_p1)
}
  0x23   :  { %22 = dma.hbm_to_vmem [thread:$0]  %s622_s0, 128, %s20_s8, [#allocation3]  }
  0x24   :  { %s461_s22 = scalar_lea.hbm %s625_s3, 2048 }
  0x25   :  { %p462_p2 = scmp.ne.s32.totalorder %s625_s3, %s461_s22  ;;  %p465_p3 = scmp.lt.u32.totalorder %s461_s22, %s625_s3 }
  0x27   :  { %p467_p4 = pnand %p465_p3, %p462_p2 }
  0x29   :  { %470 = shalt.err (!%p467_p4)
}
  0x2a   :  { %s471_s27 = scalar_lea.vmem %s43_s10, 2048  ;;  %p476_p6 = scmp.lt.s32.totalorder %s43_s10, %s43_s10 }
  0x2b   :  { %p472_p5 = scmp.ne.s32.totalorder %s43_s10, %s471_s27  ;;  %p477_p7 = scmp.lt.s32.totalorder %s471_s27, %s471_s27 }
  0x2d   :  { %p478_p8 = por %p477_p7, %p476_p6 }
  0x2f   :  { %p479_p9 = pnand %p478_p8, %p472_p5 }
  0x31   :  { %482 = shalt.err (!%p479_p9)
}
  0x32   :  { %48 = dma.hbm_to_vmem [thread:$0]  %s625_s3, 2048, %s43_s10, [#allocation6], %s512_s28, %s512_s28, %s513_s29  }
  0x33   :  { %505 = dma.done.wait [#allocation3], 128  }
  0x34   :  { %506 = vsyncadd [#allocation3], 4294967168 }
  0x35   :  { %507 = dma.done.wait [#allocation6], 3072  }
  0x36   :  { %508 = vsyncadd [#allocation6], 4294964224  ;;  %v516_v0 = vmov 0.0|0.0   ;;  %vm517_vm0 = vmmov 0   ;;  %v518_v1 = vmov 0.0   ;;  %v61_v2 = vld [vmem:[#allocation5] sm:$0xff]  ;;  %v249_v47 = vlaneseq }
  0x37   :  { %364 = vmatprep.subr.bf16.mxu0 %v516_v0  ;;  %326 = vmatprep.mubr.msk.f32.mxu0 %vm517_vm0, %v518_v1  ;;  %v62_v3 = vld [vmem:[#allocation5 + $0x8] sm:$0xff]  ;;  %v63_v4 = vld [vmem:[#allocation5 + $0x10] sm:$0xff]  ;;  %v64_v6 = vld [vmem:[#allocation5 + $0x18] sm:$0xff]  ;;  %vm76_vm1 = vcmask 523264  }
  0x38   :  { %376 = vmatprep.subr.bf16.mxu1 %v516_v0  ;;  %361 = vmatprep.mubr.msk.f32.mxu1 %vm517_vm0, %v518_v1  ;;  %v365_v5 = vpack.c.bf16 %v62_v3, %v61_v2  ;;  %v368_v7 = vpack.c.bf16 %v64_v6, %v63_v4  ;;  %v156_v8 = vld [vmem:[#allocation7] sm:$0xff]  ;;  %v157_v9 = vld [vmem:[#allocation7 + $0x8] sm:$0xff]  ;;  %v67_v14 = vld [vmem:[#allocation5 + $0x30] sm:$0xff]  ;;  %v250_v48 = vand.u32 127, %v249_v47 }
  0x39   :  { %v65_v10 = vld [vmem:[#allocation5 + $0x20] sm:$0xff]  ;;  %v66_v11 = vld [vmem:[#allocation5 + $0x28] sm:$0xff]  ;;  %v377_v12 = vpack.c.bf16 %v157_v9, %v156_v8  ;;  %v68_v15 = vld [vmem:[#allocation5 + $0x38] sm:$0xff] }
  0x3a   :  { %366 = vmatpush3.bf16.msra.mxu0 %v365_v5  ;;  %v371_v13 = vpack.c.bf16 %v66_v11, %v65_v10  ;;  %v374_v16 = vpack.c.bf16 %v68_v15, %v67_v14  ;;  %v60_v17 = vld [vmem:[#allocation2] sm:$0xff]  ;;  %v158_v18 = vld [vmem:[#allocation7 + $0x10] sm:$0xff]  ;;  %v160_v21 = vld [vmem:[#allocation7 + $0x20] sm:$0xff]  ;;  %vm251_vm2 = vcmp.lt.s32.totalorder %v250_v48, 10 }
  0x3b   :  { %367 = vmatprep.subr.bf16.mxu0 %v516_v0  ;;  %378 = vmatpush3.bf16.msra.mxu1 %v377_v12  ;;  %v159_v19 = vld [vmem:[#allocation7 + $0x18] sm:$0xff]  ;;  %v161_v22 = vld [vmem:[#allocation7 + $0x28] sm:$0xff]  ;;  %v162_v24 = vld [vmem:[#allocation7 + $0x30] sm:$0xff] }
  0x3c   :  { %379 = vmatprep.subr.bf16.mxu1 %v516_v0  ;;  %v380_v20 = vpack.c.bf16 %v159_v19, %v158_v18  ;;  %v383_v23 = vpack.c.bf16 %v161_v22, %v160_v21  ;;  %v163_v25 = vld [vmem:[#allocation7 + $0x38] sm:$0xff]  ;;  %v164_v27 = vld [vmem:[#allocation7 + $0x40] sm:$0xff]  ;;  %v165_v28 = vld [vmem:[#allocation7 + $0x48] sm:$0xff] }
  0x3d   :  { %v386_v26 = vpack.c.bf16 %v163_v25, %v162_v24  ;;  %v389_v29 = vpack.c.bf16 %v165_v28, %v164_v27  ;;  %v166_v30 = vld [vmem:[#allocation7 + $0x50] sm:$0xff]  ;;  %v167_v31 = vld [vmem:[#allocation7 + $0x58] sm:$0xff]  ;;  %v168_v33 = vld [vmem:[#allocation7 + $0x60] sm:$0xff] }
  0x3e   :  { %369 = vmatpush3.bf16.msra.mxu0 %v368_v7  ;;  %v392_v32 = vpack.c.bf16 %v167_v31, %v166_v30  ;;  %v169_v34 = vld [vmem:[#allocation7 + $0x68] sm:$0xff]  ;;  %v170_v36 = vld [vmem:[#allocation7 + $0x70] sm:$0xff]  ;;  %v171_v37 = vld [vmem:[#allocation7 + $0x78] sm:$0xff] }
  0x3f   :  { %370 = vmatprep.subr.bf16.mxu0 %v516_v0  ;;  %381 = vmatpush3.bf16.msra.mxu1 %v380_v20  ;;  %v395_v35 = vpack.c.bf16 %v169_v34, %v168_v33  ;;  %v398_v38 = vpack.c.bf16 %v171_v37, %v170_v36  ;;  %v280_v39 = vld [vmem:[%s624_s2] ss:$0 sm:$0xff]  ;;  %s519_s2 = smov [#allocation8]  }
  0x40   :  { %382 = vmatprep.subr.bf16.mxu1 %v516_v0  ;;  %v283_v49 = vld [vmem:[%s626_s4] ss:$0 sm:$0xff]  ;;  %s270_s7 = sshll.u32 %s519_s2, 4  ;;  %s271_s7 = int_to_ptr.vmem [resolvable:$true] %s270_s7 }
  0x41   :  { %s483_s4 = scalar_lea.vmem %s271_s7, 128  ;;  %p488_p11 = scmp.lt.s32.totalorder %s271_s7, %s271_s7 }
  0x42   :  { %372 = vmatpush3.bf16.msra.mxu0 %v371_v13  ;;  %p484_p10 = scmp.ne.s32.totalorder %s271_s7, %s483_s4  ;;  %p489_p12 = scmp.lt.s32.totalorder %s483_s4, %s483_s4 }
  0x43   :  { %373 = vmatprep.subr.bf16.mxu0 %v516_v0  ;;  %384 = vmatpush3.bf16.msra.mxu1 %v383_v23 }
  0x44   :  { %385 = vmatprep.subr.bf16.mxu1 %v516_v0  ;;  %p490_p13 = por %p489_p12, %p488_p11 }
  0x46   :  { %375 = vmatpush3.bf16.msra.mxu0 %v374_v16  ;;  %p491_p0 = pnand %p490_p13, %p484_p10 }
  0x47   :  { %387 = vmatpush3.bf16.msra.mxu1 %v386_v26 }
  0x48   :  { %388 = vmatprep.subr.bf16.mxu1 %v516_v0 }
  0x49   :  { %327 = vmatmul.mubr.msk.f32.vlgmr.msra.gmra.mrb[0].mxu0 %vm76_vm1, %v60_v17 }
  0x4b   :  { %390 = vmatpush3.bf16.msra.mxu1 %v389_v29 }
  0x4c   :  { %391 = vmatprep.subr.bf16.mxu1 %v516_v0 }
  0x4f   :  { %393 = vmatpush3.bf16.msra.mxu1 %v392_v32 }
  0x50   :  { %394 = vmatprep.subr.bf16.mxu1 %v516_v0 }
  0x53   :  { %396 = vmatpush3.bf16.msra.mxu1 %v395_v35 }
  0x54   :  { %397 = vmatprep.subr.bf16.mxu1 %v516_v0 }
  0x57   :  { %399 = vmatpush3.bf16.msra.mxu1 %v398_v38 }
 0x11c   :  { %v146_v40 = vpop.f32.mrb[0].mxu0 }
 0x11d   :  { %v147_v41 = vadd.f32 %v280_v39, %v146_v40  ;;  %v328_v42 = vpop.f32.mrb[1].mxu0 }
 0x11f   :  { %v282_v43 = vmul.f32 -1.442695, %v147_v41 }
 0x121   :  { %409 = vpow2.f32 %v282_v43 }
 0x12b   :  { %v410_v44 = vpop.eup %409 }
 0x12c   :  { %v153_v45 = vadd.f32 1.0, %v410_v44 }
 0x12e   :  { %411 = vrcp.f32 %v153_v45 }
 0x138   :  { %v412_v46 = vpop.eup %411 }
 0x139   :  { %362 = vmatmul.mubr.f32.vlgmr.msra.gmra.mrb[0].mxu1 %v412_v46 }
 0x20c   :  { %v245_v50 = vpop.f32.mrb[0].mxu1 }
 0x20d   :  { %v246_v51 = vadd.f32 %v283_v49, %v245_v50  ;;  %v363_v52 = vpop.f32.mrb[1].mxu1 }
 0x20f   :  { %v252_v53 = vsel %vm251_vm2, %v246_v51, -1e+30 }
 0x210   :  { %253 = vmax.xlane.f32.xlu0 %v252_v53 }
 0x29d   :  { %v254_v54 = vpop.xlane.xlu0 %253 }
 0x29e   :  { %v255_v55 = vsub.f32 %v252_v53, %v254_v54 }
 0x2a0   :  { %v256_v56 = vmul.f32 1.442695, %v255_v55 }
 0x2a2   :  { %413 = vpow2.f32 %v256_v56 }
 0x2ac   :  { %v414_v57 = vpop.eup %413 }
 0x2ad   :  { %258 = vadd.xlane.f32.xlu0 %v414_v57 }
 0x33a   :  { %v259_v58 = vpop.xlane.xlu0 %258 }
 0x33b   :  { %415 = vlog2.f32 %v259_v58 }
 0x345   :  { %v416_v59 = vpop.eup %415 }
 0x346   :  { %v261_v60 = vmul.f32 0.6931472, %v416_v59 }
 0x348   :  { %v262_v61 = vsub.f32 %v255_v55, %v261_v60 }
 0x34a   :  { %263 = vst [vmem:[#allocation8] sm:$0xff] %v262_v61 }
 0x34b   :  { %494 = shalt.err (!%p491_p0)
}
 0x34c   :  { %s495_s10 = scalar_lea.hbm %s627_s5, 128 }
 0x34d   :  { %p496_p1 = scmp.ne.s32.totalorder %s627_s5, %s495_s10  ;;  %p499_p2 = scmp.lt.u32.totalorder %s495_s10, %s627_s5 }
 0x34f   :  { %p501_p3 = pnand %p499_p2, %p496_p1 }
 0x351   :  { %504 = shalt.err (!%p501_p3)
}
 0x352   :  { %273 = dma.vmem_to_hbm [thread:$0]  %s271_s7, 128, %s627_s5, [#allocation4]  }
 0x353   :  { %509 = dma.done.wait [#allocation4], 128  }
 0x354   :  { %510 = vsyncadd [#allocation4], 4294967168 }
 0x355   :  { %277 = vsyncpa [#allocation3], 1 }
 0x356   :  { %278 = vsyncpa [#allocation6], 1 }
 0x357   :  { %279 = vsyncpa [#allocation4], 1 }

</bundles_post_ra>
